<compile_context>
chip_gen: v5e
topology: v5e:2x2
jax: 0.10.0
libtpu: 0.0.40
codegen_flags: <defaults>
</compile_context>

<pallas_src>
import functools
import math

import jax
import jax.numpy as jnp
from jax.experimental import pallas as pl
from jax.experimental.pallas import tpu as pltpu


# ---------------------------------------------------------------------------
# per-generation VMEM sizing
# ---------------------------------------------------------------------------

@functools.lru_cache(maxsize=1)
def _vmem_config():
    """(vmem_limit_bytes, streamed_tile_budget_bytes) with headroom per chip."""
    try:
        cap = int(pltpu.get_tpu_info().vmem_capacity_bytes)
    except Exception:
        cap = 64 << 20  # conservative default (v7x-sized)
    limit = int(cap * 0.80)    # ~51 MiB on v7x, ~102 MiB on v5e/v6e
    budget = int(cap * 0.35)   # double-buffered streamed-tile budget
    return limit, budget


def _compiler_params(dimension_semantics):
    limit, _ = _vmem_config()
    return pltpu.CompilerParams(
        dimension_semantics=dimension_semantics,
        vmem_limit_bytes=limit,
    )


def _sublane_multiple(dtype) -> int:
    return {4: 8, 2: 16, 1: 32}.get(jnp.dtype(dtype).itemsize, 8)


def _pick_row_tile(rows: int, per_row_bytes: int, budget: int, sub: int,
                   cap: int = 2048) -> int:
    """Largest row tile (multiple of the sublane packing) fitting `budget`."""
    t = max(budget // max(per_row_bytes, 1), sub)
    t = max((t // sub) * sub, sub)
    t = min(t, cap)
    if t >= rows:
        return rows          # single full-extent block (always a legal block dim)
    return t


def _pick_col_tile(n_dim: int, k_dim: int, itemsize: int, budget: int) -> int:
    """Column-tile FFN weights when the resident (K, N) weight would hog VMEM."""
    full_bytes = 2 * k_dim * n_dim * itemsize
    if n_dim % 256 != 0 or full_bytes <= budget // 3:
        return n_dim
    tn = n_dim
    while (tn > 256 and n_dim % (tn // 2) == 0
           and 2 * k_dim * tn * itemsize > budget // 3):
        tn //= 2
    return tn


# ---------------------------------------------------------------------------
# LayerNorm math (torch semantics: unbiased std, eps added to std)
# ---------------------------------------------------------------------------

def _layernorm_rows(x_f32, alpha, bias, eps, d):
    mean = jnp.sum(x_f32, axis=-1, keepdims=True) * (1.0 / d)
    xc = x_f32 - mean
    var = jnp.sum(xc * xc, axis=-1, keepdims=True) * (1.0 / (d - 1))
    inv = 1.0 / (jnp.sqrt(var) + eps)          # per-row exact divide, (rows,1)
    return xc * (alpha * inv) + bias


# ---------------------------------------------------------------------------
# fused LayerNorm(1) + QKV projection kernel (x streamed once, 3 outputs)
# ---------------------------------------------------------------------------

def _ln_qkv_kernel(alpha_ref, bias_ref, x_ref, wq_ref, wk_ref, wv_ref,
                   bq_ref, bk_ref, bv_ref, q_ref, k_ref, v_ref, *, eps, d):
    x = x_ref[...].astype(jnp.float32)
    n = _layernorm_rows(x, alpha_ref[0], bias_ref[0], eps, d).astype(x_ref.dtype)
    for w_ref, b_ref, o_ref in ((wq_ref, bq_ref, q_ref),
                                (wk_ref, bk_ref, k_ref),
                                (wv_ref, bv_ref, v_ref)):
        acc = jnp.dot(n, w_ref[...], preferred_element_type=jnp.float32)
        acc = acc + b_ref[...].astype(jnp.float32)
        o_ref[...] = acc.astype(o_ref.dtype)


def _ln_qkv(x2d, alpha, bias, wq, wk, wv, bq, bk, bv, *, eps):
    rows, d = x2d.shape
    itemsize = jnp.dtype(x2d.dtype).itemsize
    _, budget = _vmem_config()
    w_bytes = 3 * 2 * d * d * jnp.dtype(wq.dtype).itemsize     # resident weights
    per_row = 2 * itemsize * (d + 3 * d) + 8 * d               # x + q/k/v + f32 temps
    sub = _sublane_multiple(x2d.dtype)
    tm = _pick_row_tile(rows, per_row, max(budget - w_bytes, 2 << 20), sub)
    grid = (pl.cdiv(rows, tm),)

    row_spec = pl.BlockSpec((tm, d), lambda i: (i, 0))
    w_spec = pl.BlockSpec((d, d), lambda i: (0, 0))
    b_spec = pl.BlockSpec((1, d), lambda i: (0, 0))
    out_sd = jax.ShapeDtypeStruct((rows, d), x2d.dtype)

    return pl.pallas_call(
        functools.partial(_ln_qkv_kernel, eps=eps, d=d),
        out_shape=(out_sd, out_sd, out_sd),
        grid_spec=pltpu.PrefetchScalarGridSpec(
            num_scalar_prefetch=0,
            grid=grid,
            in_specs=[
                pl.BlockSpec(memory_space=pltpu.SMEM),      # alpha (1,)
                pl.BlockSpec(memory_space=pltpu.SMEM),      # bias  (1,)
                row_spec, w_spec, w_spec, w_spec, b_spec, b_spec, b_spec,
            ],
            out_specs=(row_spec, row_spec, row_spec),
        ),
        compiler_params=_compiler_params(("parallel",)),
    )(alpha, bias, x2d, wq, wk, wv,
      bq.reshape(1, d), bk.reshape(1, d), bv.reshape(1, d))


# ---------------------------------------------------------------------------
# generic Linear kernel: optional fused LayerNorm on input, relu, residual add
# ---------------------------------------------------------------------------

def _linear_kernel(*refs, act, has_residual, has_ln, eps, k_dim):
    i = 0
    if has_ln:
        alpha_ref, beta_ref = refs[0], refs[1]
        i = 2
    x_ref, w_ref, b_ref = refs[i], refs[i + 1], refs[i + 2]
    r_ref = refs[i + 3] if has_residual else None
    o_ref = refs[-1]

    x = x_ref[...]
    if has_ln:
        xf = x.astype(jnp.float32)
        x = _layernorm_rows(xf, alpha_ref[0], beta_ref[0], eps, k_dim).astype(x_ref.dtype)
    acc = jnp.dot(x, w_ref[...], preferred_element_type=jnp.float32)
    acc = acc + b_ref[...].astype(jnp.float32)
    if act == "relu":
        acc = jnp.maximum(acc, 0.0)
    if has_residual:
        acc = acc + r_ref[...].astype(jnp.float32)
    o_ref[...] = acc.astype(o_ref.dtype)


def _linear(x, w, b, *, act=None, residual=None, ln=None, eps=1e-6):
    """y = act(LN?(x) @ w + b) (+ residual).  x: (rows, K); w: (K, N); b: (N,)."""
    rows, k_dim = x.shape
    kw, n_dim = w.shape
    assert kw == k_dim
    itemsize = jnp.dtype(x.dtype).itemsize
    w_item = jnp.dtype(w.dtype).itemsize
    _, budget = _vmem_config()

    tn = _pick_col_tile(n_dim, k_dim, w_item, budget)
    w_bytes = 2 * k_dim * tn * w_item
    per_row = (2 * itemsize * (k_dim + tn + (tn if residual is not None else 0))
               + 4 * tn)
    sub = _sublane_multiple(x.dtype)
    tm = _pick_row_tile(rows, per_row, max(budget - w_bytes, 2 << 20), sub)
    grid = (pl.cdiv(rows, tm), pl.cdiv(n_dim, tn))

    in_specs, args = [], []
    if ln is not None:
        in_specs += [pl.BlockSpec(memory_space=pltpu.SMEM),
                     pl.BlockSpec(memory_space=pltpu.SMEM)]
        args += [ln[0], ln[1]]
    in_specs += [
        pl.BlockSpec((tm, k_dim), lambda i, j: (i, 0)),       # x rows tile
        pl.BlockSpec((k_dim, tn), lambda i, j: (0, j)),       # weight col block
        pl.BlockSpec((1, tn), lambda i, j: (0, j)),           # bias col block
    ]
    args += [x, w, b.reshape(1, n_dim)]
    if residual is not None:
        in_specs.append(pl.BlockSpec((tm, tn), lambda i, j: (i, j)))
        args.append(residual)

    kernel = functools.partial(_linear_kernel, act=act,
                               has_residual=residual is not None,
                               has_ln=ln is not None, eps=eps, k_dim=k_dim)
    return pl.pallas_call(
        kernel,
        out_shape=jax.ShapeDtypeStruct((rows, n_dim), x.dtype),
        grid_spec=pltpu.PrefetchScalarGridSpec(
            num_scalar_prefetch=0,
            grid=grid,
            in_specs=in_specs,
            out_specs=pl.BlockSpec((tm, tn), lambda i, j: (i, j)),
        ),
        compiler_params=_compiler_params(("parallel", "parallel")),
    )(*args)


# ---------------------------------------------------------------------------
# Multi-head attention core: grid (batch, q_block), per-head direct stores
# ---------------------------------------------------------------------------

def _attention_kernel(q_ref, k_ref, v_ref, o_ref, *, h, d_k, scale):
    q = q_ref[0]                                  # (tq, D), native dtype (MXU rate)
    k = k_ref[0]                                  # (S, D)
    v = v_ref[0]
    for hd in range(h):                           # static unroll over heads
        lo = hd * d_k
        qh = q[:, lo:lo + d_k]
        kh = k[:, lo:lo + d_k]
        vh = v[:, lo:lo + d_k]
        s = jax.lax.dot_general(                  # Q @ K^T -> (tq, S), f32 acc
            qh, kh, (((1,), (1,)), ((), ())),
            preferred_element_type=jnp.float32) * scale
        # NOTE: reference's masked_fill is non-in-place and discarded -> no mask.
        m = jnp.max(s, axis=-1, keepdims=True)
        p = jnp.exp(s - m)
        l = jnp.sum(p, axis=-1, keepdims=True)
        attn = (p * pl.reciprocal(l, approx=True)).astype(v.dtype)
        oh = jnp.dot(attn, vh, preferred_element_type=jnp.float32)
        o_ref[0, :, lo:lo + d_k] = oh.astype(o_ref.dtype)   # per-head store, no concat


def _attention(q, k, v, *, h):
    batch, seq, d = q.shape
    d_k = d // h
    sub = _sublane_multiple(q.dtype)
    if seq <= 1024:
        tq = seq
    else:
        tq = max((512 // sub) * sub, sub)
    grid = (batch, pl.cdiv(seq, tq))
    kernel = functools.partial(_attention_kernel, h=h, d_k=d_k,
                               scale=1.0 / math.sqrt(d_k))
    q_spec = pl.BlockSpec((1, tq, d), lambda b, qi: (b, qi, 0))
    kv_spec = pl.BlockSpec((1, seq, d), lambda b, qi: (b, 0, 0))
    return pl.pallas_call(
        kernel,
        out_shape=jax.ShapeDtypeStruct((batch, seq, d), q.dtype),
        grid_spec=pltpu.PrefetchScalarGridSpec(
            num_scalar_prefetch=0,
            grid=grid,
            in_specs=[q_spec, kv_spec, kv_spec],
            out_specs=pl.BlockSpec((1, tq, d), lambda b, qi: (b, qi, 0)),
        ),
        compiler_params=_compiler_params(("parallel", "parallel")),
    )(q, k, v)


# ---------------------------------------------------------------------------
# EncoderBlock forward
# ---------------------------------------------------------------------------

def encoder_block_forward(x, src_mask, params, *, h, eps: float = 1e-6):
    """EncoderBlock forward (inference).

    src_mask is accepted for signature parity but, exactly as in the reference
    (non-in-place masked_fill whose result is discarded), it has no effect.
    Dropout layers are identity (eval mode).
    """
    del src_mask
    B, S, D = x.shape
    rows = B * S
    xf = x.reshape(rows, D)

    # --- residual branch 1: x + w_o(self_attention(norm1(x))) ---
    q2d, k2d, v2d = _ln_qkv(xf, params["ln1_alpha"], params["ln1_bias"],
                            params["wq"], params["wk"], params["wv"],
                            params["bq"], params["bk"], params["bv"], eps=eps)
    attn = _attention(q2d.reshape(B, S, D), k2d.reshape(B, S, D),
                      v2d.reshape(B, S, D), h=h)
    h1 = _linear(attn.reshape(rows, D), params["wo"], params["bo"], residual=xf)

    # --- residual branch 2: h1 + linear_2(relu(linear_1(norm2(h1)))) ---
    ff = _linear(h1, params["w1"], params["b1"], act="relu",
                 ln=(params["ln2_alpha"], params["ln2_bias"]), eps=eps)
    out = _linear(ff, params["w2"], params["b2"], residual=h1)

    return out.reshape(B, S, D)


# ---------------------------------------------------------------------------
# pure-JAX reference (mirrors the PyTorch module exactly)
# ---------------------------------------------------------------------------

def _reference_forward(x, src_mask, p, *, h, eps=1e-6):
    del src_mask  # no effect in the reference (non-in-place masked_fill)

    def ln(t, a, b):
        mean = t.mean(-1, keepdims=True)
        var = jnp.sum((t - mean) ** 2, -1, keepdims=True) / (t.shape[-1] - 1)
        std = jnp.sqrt(var)
        return a[0] * (t - mean) / (std + eps) + b[0]

    B, S, D = x.shape
    d_k = D // h
    n1 = ln(x, p["ln1_alpha"], p["ln1_bias"])
    q = n1 @ p["wq"] + p["bq"]
    k = n1 @ p["wk"] + p["bk"]
    v = n1 @ p["wv"] + p["bv"]
    qh = q.reshape(B, S, h, d_k).transpose(0, 2, 1, 3)
    kh = k.reshape(B, S, h, d_k).transpose(0, 2, 1, 3)
    vh = v.reshape(B, S, h, d_k).transpose(0, 2, 1, 3)
    s = jnp.einsum("bhqd,bhkd->bhqk", qh, kh) / math.sqrt(d_k)
    a = jax.nn.softmax(s, axis=-1)
    o = jnp.einsum("bhqk,bhkd->bhqd", a, vh).transpose(0, 2, 1, 3).reshape(B, S, D)
    x1 = x + (o @ p["wo"] + p["bo"])
    n2 = ln(x1, p["ln2_alpha"], p["ln2_bias"])
    ff = jnp.maximum(n2 @ p["w1"] + p["b1"], 0.0) @ p["w2"] + p["b2"]
    return x1 + ff


# ---------------------------------------------------------------------------
# main
# ---------------------------------------------------------------------------

if __name__ == "__main__":
    B, S, D, H, DFF = 2, 8, 32, 4, 64
    key = jax.random.PRNGKey(0)
    keys = jax.random.split(key, 13)

    def wgen(kk, shape):
        return 0.1 * jax.random.normal(kk, shape, dtype=jnp.float32)

    params = {
        "ln1_alpha": jnp.full((1,), 1.10, jnp.float32),
        "ln1_bias": jnp.full((1,), -0.05, jnp.float32),
        "ln2_alpha": jnp.full((1,), 0.90, jnp.float32),
        "ln2_bias": jnp.full((1,), 0.02, jnp.float32),
        "wq": wgen(keys[0], (D, D)), "bq": wgen(keys[1], (D,)),
        "wk": wgen(keys[2], (D, D)), "bk": wgen(keys[3], (D,)),
        "wv": wgen(keys[4], (D, D)), "bv": wgen(keys[5], (D,)),
        "wo": wgen(keys[6], (D, D)), "bo": wgen(keys[7], (D,)),
        "w1": wgen(keys[8], (D, DFF)), "b1": wgen(keys[9], (DFF,)),
        "w2": wgen(keys[10], (DFF, D)), "b2": wgen(keys[11], (D,)),
    }
    x = jax.random.normal(keys[12], (B, S, D), dtype=jnp.float32)
    src_mask = jnp.ones((B, 1, 1, S), dtype=jnp.float32)

    out = encoder_block_forward(x, src_mask, params, h=H)
    out = jax.block_until_ready(out)

    ref = _reference_forward(x, src_mask, params, h=H)
    assert out.shape == (B, S, D)
    # Tolerance accounts for the EUP approximate reciprocal (~2^-12 rel err)
    # used only in the softmax normalization; LayerNorm uses exact per-row math.
    max_err = float(jnp.max(jnp.abs(out - ref)))
    assert jnp.allclose(out, ref, atol=2e-3, rtol=2e-3), f"mismatch, max_err={max_err}"

    print("KERNEL_OK")
</pallas_src>

<mosaic_0001>
module attributes {stable_mosaic.version = 11 : i64} {
  func.func @_ln_qkv_kernel(%arg0: i32, %arg1: memref<1xf32, #tpu.memory_space<smem>>, %arg2: memref<1xf32, #tpu.memory_space<smem>>, %arg3: memref<16x32xf32, #tpu.memory_space<vmem>>, %arg4: memref<32x32xf32, #tpu.memory_space<vmem>>, %arg5: memref<32x32xf32, #tpu.memory_space<vmem>>, %arg6: memref<32x32xf32, #tpu.memory_space<vmem>>, %arg7: memref<1x32xf32, #tpu.memory_space<vmem>>, %arg8: memref<1x32xf32, #tpu.memory_space<vmem>>, %arg9: memref<1x32xf32, #tpu.memory_space<vmem>>, %arg10: memref<16x32xf32, #tpu.memory_space<vmem>>, %arg11: memref<16x32xf32, #tpu.memory_space<vmem>>, %arg12: memref<16x32xf32, #tpu.memory_space<vmem>>) attributes {dimension_semantics = [#tpu.dimension_semantics<parallel>], iteration_bounds = array<i64: 1>, scalar_prefetch = 0 : i64, scratch_operands = 0 : i64, tpu.core_type = #tpu.core_type<tc>, window_params = [{transform_indices = @transform_0, window_bounds = array<i64: 1>}, {transform_indices = @transform_1, window_bounds = array<i64: 1>}, {transform_indices = @transform_2, window_bounds = array<i64: 16, 32>}, {pipeline_mode = #tpu.pipeline_mode<synchronous>, transform_indices = @transform_3, window_bounds = array<i64: 32, 32>}, {pipeline_mode = #tpu.pipeline_mode<synchronous>, transform_indices = @transform_4, window_bounds = array<i64: 32, 32>}, {pipeline_mode = #tpu.pipeline_mode<synchronous>, transform_indices = @transform_5, window_bounds = array<i64: 32, 32>}, {pipeline_mode = #tpu.pipeline_mode<synchronous>, transform_indices = @transform_6, window_bounds = array<i64: 1, 32>}, {pipeline_mode = #tpu.pipeline_mode<synchronous>, transform_indices = @transform_7, window_bounds = array<i64: 1, 32>}, {pipeline_mode = #tpu.pipeline_mode<synchronous>, transform_indices = @transform_8, window_bounds = array<i64: 1, 32>}, {transform_indices = @transform_9, window_bounds = array<i64: 16, 32>}, {transform_indices = @transform_10, window_bounds = array<i64: 16, 32>}, {transform_indices = @transform_11, window_bounds = array<i64: 16, 32>}]} {
    %c0 = arith.constant 0 : index
    %c0_0 = arith.constant 0 : index
    %0 = vector.load %arg3[%c0, %c0_0] : memref<16x32xf32, #tpu.memory_space<vmem>>, vector<16x32xf32>
    %c0_1 = arith.constant 0 : index
    %1 = memref.load %arg1[%c0_1] : memref<1xf32, #tpu.memory_space<smem>>
    %c0_2 = arith.constant 0 : index
    %2 = memref.load %arg2[%c0_2] : memref<1xf32, #tpu.memory_space<smem>>
    %cst = arith.constant dense<0.000000e+00> : vector<16xf32>
    %3 = vector.multi_reduction <add>, %0, %cst [1] : vector<16x32xf32> to vector<16xf32>
    %4 = vector.shape_cast %3 : vector<16xf32> to vector<16x1xf32>
    %cst_3 = arith.constant 3.125000e-02 : f32
    %5 = vector.broadcast %cst_3 : f32 to vector<16x1xf32>
    %6 = arith.mulf %4, %5 : vector<16x1xf32>
    %7 = vector.broadcast %6 : vector<16x1xf32> to vector<16x32xf32>
    %8 = arith.subf %0, %7 : vector<16x32xf32>
    %9 = arith.mulf %8, %8 : vector<16x32xf32>
    %cst_4 = arith.constant dense<0.000000e+00> : vector<16xf32>
    %10 = vector.multi_reduction <add>, %9, %cst_4 [1] : vector<16x32xf32> to vector<16xf32>
    %11 = vector.shape_cast %10 : vector<16xf32> to vector<16x1xf32>
    %cst_5 = arith.constant 0.0322580636 : f32
    %12 = vector.broadcast %cst_5 : f32 to vector<16x1xf32>
    %13 = arith.mulf %11, %12 : vector<16x1xf32>
    %14 = math.sqrt %13 : vector<16x1xf32>
    %cst_6 = arith.constant 9.99999997E-7 : f32
    %15 = vector.broadcast %cst_6 : f32 to vector<16x1xf32>
    %16 = arith.addf %14, %15 : vector<16x1xf32>
    %cst_7 = arith.constant 1.000000e+00 : f32
    %17 = vector.broadcast %cst_7 : f32 to vector<16x1xf32>
    %18 = arith.divf %17, %16 : vector<16x1xf32>
    %19 = vector.broadcast %1 : f32 to vector<16x1xf32>
    %20 = arith.mulf %19, %18 : vector<16x1xf32>
    %21 = vector.broadcast %20 : vector<16x1xf32> to vector<16x32xf32>
    %22 = arith.mulf %8, %21 : vector<16x32xf32>
    %23 = vector.broadcast %2 : f32 to vector<16x32xf32>
    %24 = arith.addf %22, %23 : vector<16x32xf32>
    %c0_8 = arith.constant 0 : index
    %c0_9 = arith.constant 0 : index
    %25 = vector.load %arg4[%c0_8, %c0_9] : memref<32x32xf32, #tpu.memory_space<vmem>>, vector<32x32xf32>
    %cst_10 = arith.constant dense<0.000000e+00> : vector<16x32xf32>
    %26 = tpu.matmul %24, %25, %cst_10 {dimension_numbers = #tpu.dot_dimension_numbers<[1], [0], [0], [1], [0, 0, 1, 1], [], []>} : vector<16x32xf32>, vector<32x32xf32>, vector<16x32xf32> -> vector<16x32xf32>
    %c0_11 = arith.constant 0 : index
    %c0_12 = arith.constant 0 : index
    %27 = vector.load %arg7[%c0_11, %c0_12] : memref<1x32xf32, #tpu.memory_space<vmem>>, vector<1x32xf32>
    %28 = vector.broadcast %27 : vector<1x32xf32> to vector<16x32xf32>
    %29 = arith.addf %26, %28 : vector<16x32xf32>
    %c0_13 = arith.constant 0 : index
    %c0_14 = arith.constant 0 : index
    %30 = vector.load %arg10[%c0_13, %c0_14] : memref<16x32xf32, #tpu.memory_space<vmem>>, vector<16x32xf32>
    tpu.vector_store %arg10[%c0_13, %c0_14], %29 {strides = array<i32>} : memref<16x32xf32, #tpu.memory_space<vmem>>, vector<16x32xf32>,
    %c0_15 = arith.constant 0 : index
    %c0_16 = arith.constant 0 : index
    %31 = vector.load %arg5[%c0_15, %c0_16] : memref<32x32xf32, #tpu.memory_space<vmem>>, vector<32x32xf32>
    %cst_17 = arith.constant dense<0.000000e+00> : vector<16x32xf32>
    %32 = tpu.matmul %24, %31, %cst_17 {dimension_numbers = #tpu.dot_dimension_numbers<[1], [0], [0], [1], [0, 0, 1, 1], [], []>} : vector<16x32xf32>, vector<32x32xf32>, vector<16x32xf32> -> vector<16x32xf32>
    %c0_18 = arith.constant 0 : index
    %c0_19 = arith.constant 0 : index
    %33 = vector.load %arg8[%c0_18, %c0_19] : memref<1x32xf32, #tpu.memory_space<vmem>>, vector<1x32xf32>
    %34 = vector.broadcast %33 : vector<1x32xf32> to vector<16x32xf32>
    %35 = arith.addf %32, %34 : vector<16x32xf32>
    %c0_20 = arith.constant 0 : index
    %c0_21 = arith.constant 0 : index
    %36 = vector.load %arg11[%c0_20, %c0_21] : memref<16x32xf32, #tpu.memory_space<vmem>>, vector<16x32xf32>
    tpu.vector_store %arg11[%c0_20, %c0_21], %35 {strides = array<i32>} : memref<16x32xf32, #tpu.memory_space<vmem>>, vector<16x32xf32>,
    %c0_22 = arith.constant 0 : index
    %c0_23 = arith.constant 0 : index
    %37 = vector.load %arg6[%c0_22, %c0_23] : memref<32x32xf32, #tpu.memory_space<vmem>>, vector<32x32xf32>
    %cst_24 = arith.constant dense<0.000000e+00> : vector<16x32xf32>
    %38 = tpu.matmul %24, %37, %cst_24 {dimension_numbers = #tpu.dot_dimension_numbers<[1], [0], [0], [1], [0, 0, 1, 1], [], []>} : vector<16x32xf32>, vector<32x32xf32>, vector<16x32xf32> -> vector<16x32xf32>
    %c0_25 = arith.constant 0 : index
    %c0_26 = arith.constant 0 : index
    %39 = vector.load %arg9[%c0_25, %c0_26] : memref<1x32xf32, #tpu.memory_space<vmem>>, vector<1x32xf32>
    %40 = vector.broadcast %39 : vector<1x32xf32> to vector<16x32xf32>
    %41 = arith.addf %38, %40 : vector<16x32xf32>
    %c0_27 = arith.constant 0 : index
    %c0_28 = arith.constant 0 : index
    %42 = vector.load %arg12[%c0_27, %c0_28] : memref<16x32xf32, #tpu.memory_space<vmem>>, vector<16x32xf32>
    tpu.vector_store %arg12[%c0_27, %c0_28], %41 {strides = array<i32>} : memref<16x32xf32, #tpu.memory_space<vmem>>, vector<16x32xf32>,
    return
  }
  func.func @transform_0(%arg0: i32) -> i32 {
    %c0_i32 = arith.constant 0 : i32
    %c0_i32_0 = arith.constant 0 : i32
    return %c0_i32 : i32
  }
  func.func @transform_1(%arg0: i32) -> i32 {
    %c0_i32 = arith.constant 0 : i32
    %c0_i32_0 = arith.constant 0 : i32
    return %c0_i32 : i32
  }
  func.func @transform_2(%arg0: i32) -> (i32, i32) {
    %c0_i32 = arith.constant 0 : i32
    %c0_i32_0 = arith.constant 0 : i32
    return %arg0, %c0_i32 : i32, i32
  }
  func.func @transform_3(%arg0: i32) -> (i32, i32) {
    %c0_i32 = arith.constant 0 : i32
    %c0_i32_0 = arith.constant 0 : i32
    %c0_i32_1 = arith.constant 0 : i32
    return %c0_i32, %c0_i32_0 : i32, i32
  }
  func.func @transform_4(%arg0: i32) -> (i32, i32) {
    %c0_i32 = arith.constant 0 : i32
    %c0_i32_0 = arith.constant 0 : i32
    %c0_i32_1 = arith.constant 0 : i32
    return %c0_i32, %c0_i32_0 : i32, i32
  }
  func.func @transform_5(%arg0: i32) -> (i32, i32) {
    %c0_i32 = arith.constant 0 : i32
    %c0_i32_0 = arith.constant 0 : i32
    %c0_i32_1 = arith.constant 0 : i32
    return %c0_i32, %c0_i32_0 : i32, i32
  }
  func.func @transform_6(%arg0: i32) -> (i32, i32) {
    %c0_i32 = arith.constant 0 : i32
    %c0_i32_0 = arith.constant 0 : i32
    %c0_i32_1 = arith.constant 0 : i32
    return %c0_i32, %c0_i32_0 : i32, i32
  }
  func.func @transform_7(%arg0: i32) -> (i32, i32) {
    %c0_i32 = arith.constant 0 : i32
    %c0_i32_0 = arith.constant 0 : i32
    %c0_i32_1 = arith.constant 0 : i32
    return %c0_i32, %c0_i32_0 : i32, i32
  }
  func.func @transform_8(%arg0: i32) -> (i32, i32) {
    %c0_i32 = arith.constant 0 : i32
    %c0_i32_0 = arith.constant 0 : i32
    %c0_i32_1 = arith.constant 0 : i32
    return %c0_i32, %c0_i32_0 : i32, i32
  }
  func.func @transform_9(%arg0: i32) -> (i32, i32) {
    %c0_i32 = arith.constant 0 : i32
    %c0_i32_0 = arith.constant 0 : i32
    return %arg0, %c0_i32 : i32, i32
  }
  func.func @transform_10(%arg0: i32) -> (i32, i32) {
    %c0_i32 = arith.constant 0 : i32
    %c0_i32_0 = arith.constant 0 : i32
    return %arg0, %c0_i32 : i32, i32
  }
  func.func @transform_11(%arg0: i32) -> (i32, i32) {
    %c0_i32 = arith.constant 0 : i32
    %c0_i32_0 = arith.constant 0 : i32
    return %arg0, %c0_i32 : i32, i32
  }
}

</mosaic_0001>

<bundles_post_ra>
// kernel: tpu_custom_call.1
= control target key start
LH: loop header
LB: loop body
LE: loop exit
PB: predicated region body
PF: predicated region fallthrough
CT: control target
= control target key end

     0   :  { %19 = vsyncpa [#allocation5], 0  ;;  %s712_s0 = inlined_call_operand.<no memory space> [shape: f32[1], index: 0, kind: input, shape index: {}]   ;;  %s713_s1 = inlined_call_operand.<no memory space> [shape: f32[1], index: 1, kind: input, shape index: {}]   ;;  %s714_s2 = inlined_call_operand.hbm [shape: f32[16,32], index: 2, kind: input, shape index: {}]   ;;  %s715_s3 = inlined_call_operand.hbm [shape: f32[32,32], index: 3, kind: input, shape index: {}]   ;;  %s716_s4 = inlined_call_operand.hbm [shape: f32[32,32], index: 4, kind: input, shape index: {}]   ;;  %s717_s5 = inlined_call_operand.hbm [shape: f32[32,32], index: 5, kind: input, shape index: {}]   ;;  %s718_s6 = inlined_call_operand.vmem [shape: f32[1,32], index: 6, kind: input, shape index: {}]   ;;  %s719_s7 = inlined_call_operand.vmem [shape: f32[1,32], index: 7, kind: input, shape index: {}]   ;;  %s720_s8 = inlined_call_operand.vmem [shape: f32[1,32], index: 8, kind: input, shape index: {}]   ;;  %s721_s9 = inlined_call_operand.hbm [shape: f32[16,32], index: 9, kind: output, shape index: {0}]   ;;  %s722_s10 = inlined_call_operand.hbm [shape: f32[16,32], index: 10, kind: output, shape index: {1}]   ;;  %s723_s11 = inlined_call_operand.hbm [shape: f32[16,32], index: 11, kind: output, shape index: {2}]  }
   0x1   :  { %20 = vsyncpa [#allocation8], 0 }
   0x2   :  { %21 = vsyncpa [#allocation11], 0 }
   0x3   :  { %22 = vsyncpa [#allocation6], 0 }
   0x4   :  { %23 = vsyncpa [#allocation14], 0  ;;  %s45_s19 = sshll.u32 %s715_s3, 4  ;;  %s560_s20 = smov [#allocation7]   ;;  %s46_s19 = int_to_ptr.hbm [resolvable:$true] %s45_s19 }
   0x5   :  { %s47_s21 = sshll.u32 %s560_s20, 4  ;;  %s32_s24 = sshll.u32 %s714_s2, 4  ;;  %s48_s21 = int_to_ptr.vmem [resolvable:$true] %s47_s21  ;;  %s33_s24 = int_to_ptr.hbm [resolvable:$true] %s32_s24 }
   0x6   :  { %s561_s25 = smov 128   ;;  %s562_s26 = smov 8  }
   0x7   :  { %53 = dma.hbm_to_vmem [thread:$0]  %s46_s19, 512, %s48_s21, [#allocation8], %s561_s25, %s561_s25, %s562_s26  }
   0x8   :  { %s563_s27 = smov [#allocation4]   ;;  %s58_s3 = sshll.u32 %s716_s4, 4  ;;  %s59_s3 = int_to_ptr.hbm [resolvable:$true] %s58_s3 }
   0x9   :  { %s34_s28 = sshll.u32 %s563_s27, 4  ;;  %s71_s13 = sshll.u32 %s717_s5, 4  ;;  %s35_s28 = int_to_ptr.vmem [resolvable:$true] %s34_s28  ;;  %s72_s13 = int_to_ptr.hbm [resolvable:$true] %s71_s13 }
   0xa   :  { %40 = dma.hbm_to_vmem [thread:$0]  %s33_s24, 256, %s35_s28, [#allocation5], %s561_s25, %s561_s25, %s562_s26  }
   0xb   :  { %s564_s14 = smov [#allocation9]   ;;  %s565_s16 = smov [#allocation10]  }
   0xc   :  { %s60_s15 = sshll.u32 %s564_s14, 4  ;;  %s73_s4 = sshll.u32 %s565_s16, 4  ;;  %s61_s15 = int_to_ptr.vmem [resolvable:$true] %s60_s15  ;;  %s74_s4 = int_to_ptr.vmem [resolvable:$true] %s73_s4 }
   0xd   :  { %66 = dma.hbm_to_vmem [thread:$0]  %s59_s3, 512, %s61_s15, [#allocation8], %s561_s25, %s561_s25, %s562_s26  }
   0xe   :  { %79 = dma.hbm_to_vmem [thread:$0]  %s72_s13, 512, %s74_s4, [#allocation11], %s561_s25, %s561_s25, %s562_s26  }
   0xf   :  { %550 = dma.done.wait [#allocation5], 256  }
  0x10   :  { %551 = vsyncadd [#allocation5], 4294967040 }
  0x11   :  { %552 = dma.done.wait [#allocation8], 1024  }
  0x12   :  { %553 = vsyncadd [#allocation8], 4294966272 }
  0x13   :  { %554 = dma.done.wait [#allocation11], 512  }
  0x14   :  { %555 = vsyncadd [#allocation11], 4294966784  ;;  %vm106_vm0 = vcmask 261120   ;;  %v102_v0 = vld [vmem:[#allocation4] sm:$0xff]  ;;  %v103_v2 = vld [vmem:[#allocation4 + $0x8] sm:$0xff]  ;;  %v183_v61 = vstv %s712_s0  ;;  %s566_s24 = smov [#allocation13]  }
  0x15   :  { %v107_v1 = vsel %vm106_vm0, %v102_v0, 0.0  ;;  %v110_v3 = vsel %vm106_vm0, %v103_v2, 0.0  ;;  %v194_v14 = vld [vmem:[#allocation7 + $0x18] sm:$0xff]  ;;  %v193_v17 = vld [vmem:[#allocation7 + $0x10] sm:$0xff]  ;;  %v192_v21 = vld [vmem:[#allocation7 + $0x8] sm:$0xff]  ;;  %s313_s27 = sshll.u32 %s566_s24, 4  ;;  %s314_s27 = int_to_ptr.vmem [resolvable:$true] %s313_s27 }
  0x16   :  { %108 = vadd.xlane.f32.xlu0 %v107_v1  ;;  %v233_v15 = vld [vmem:[#allocation9 + $0x18] sm:$0xff]  ;;  %217 = vmatpush.msra.mxu0 %v194_v14  ;;  %v232_v18 = vld [vmem:[#allocation9 + $0x10] sm:$0xff]  ;;  %v231_v22 = vld [vmem:[#allocation9 + $0x8] sm:$0xff]  ;;  %s315_s29 = sshll.u32 %s722_s10, 4  ;;  %s302_s2 = sshll.u32 %s721_s9, 4  ;;  %s316_s29 = int_to_ptr.hbm [resolvable:$true] %s315_s29  ;;  %s303_s2 = int_to_ptr.hbm [resolvable:$true] %s302_s2 }
  0x17   :  { %v266_v16 = vld [vmem:[#allocation10 + $0x18] sm:$0xff]  ;;  %250 = vmatpush.msra.mxu1 %v233_v15  ;;  %v265_v19 = vld [vmem:[#allocation10 + $0x10] sm:$0xff]  ;;  %358 = vmatpush.msra.mxu3 %v194_v14  ;;  %v264_v24 = vld [vmem:[#allocation10 + $0x8] sm:$0xff]  ;;  %s568_s10 = smov [#allocation15]   ;;  %s328_s15 = sshll.u32 %s723_s11, 4  ;;  %s329_s15 = int_to_ptr.hbm [resolvable:$true] %s328_s15 }
  0x18   :  { %283 = vmatpush.msra.mxu2 %v266_v16  ;;  %218 = vmatpush.msra.mxu0 %v193_v17  ;;  %v191_v25 = vld [vmem:[#allocation7] sm:$0xff]  ;;  %s326_s12 = sshll.u32 %s568_s10, 4  ;;  %s327_s12 = int_to_ptr.vmem [resolvable:$true] %s326_s12 }
  0x19   :  { %251 = vmatpush.msra.mxu1 %v232_v18  ;;  %v230_v26 = vld [vmem:[#allocation9] sm:$0xff]  ;;  %359 = vmatpush.msra.mxu3 %v193_v17  ;;  %v371_v17 = vld [vmem:[%s718_s6] ss:$0 sm:$0xff] }
  0x1a   :  { %284 = vmatpush.msra.mxu2 %v265_v19  ;;  %219 = vmatpush.msra.mxu0 %v192_v21  ;;  %v263_v27 = vld [vmem:[#allocation10] sm:$0xff]  ;;  %v372_v18 = vld [vmem:[%s719_s7] ss:$0 sm:$0xff]  ;;  %s567_s7 = smov [#allocation12]  }
  0x1b   :  { %252 = vmatpush.msra.mxu1 %v231_v22  ;;  %360 = vmatpush.msra.mxu3 %v192_v21  ;;  %s300_s30 = sshll.u32 %s567_s7, 4  ;;  %s301_s30 = int_to_ptr.vmem [resolvable:$true] %s300_s30 }
  0x1c   :  { %285 = vmatpush.msra.mxu2 %v264_v24  ;;  %220 = vmatpush.msra.mxu0 %v191_v25 }
  0x1d   :  { %253 = vmatpush.msra.mxu1 %v230_v26  ;;  %361 = vmatpush.msra.mxu3 %v191_v25 }
  0x1e   :  { %111 = vadd.xlane.f32.xlu0 %v110_v3  ;;  %286 = vmatpush.msra.mxu2 %v263_v27  ;;  %v188_v3 = vstv %s713_s1 }
  0x89   :  { %v109_v4 = vpop.xlane.xlu0 %108 }
  0x8a   :  { %v113_v5 = vmul.f32 0.03125, %v109_v4 }
  0x8c   :  { %v655_v6 = vsub.f32 %v102_v0, %v113_v5 }
  0x8e   :  { %v117_v7 = vmul.f32 %v655_v6, %v655_v6 }
  0x90   :  { %v119_v8 = vsel %vm106_vm0, %v117_v7, 0.0 }
  0x91   :  { %120 = vadd.xlane.f32.xlu1 %v119_v8  ;;  %v112_v9 = vpop.xlane.xlu0 %111 }
  0x92   :  { %v114_v10 = vmul.f32 0.03125, %v112_v9 }
  0x94   :  { %v660_v11 = vsub.f32 %v103_v2, %v114_v10 }
  0x96   :  { %v118_v12 = vmul.f32 %v660_v11, %v660_v11 }
  0x98   :  { %v122_v13 = vsel %vm106_vm0, %v118_v12, 0.0 }
  0x99   :  { %123 = vadd.xlane.f32.xlu1 %v122_v13 }
 0x104   :  { %v121_v20 = vpop.xlane.xlu1 %120 }
 0x105   :  { %v125_v23 = vmul.f32 0.032258064, %v121_v20 }
 0x107   :  { %374 = vrsqrt.f32 %v125_v23  ;;  %vm134_vm1 = vcmp.eq.f32.partialorder %v125_v23, inf  ;;  %v137_v40 = vand.u32 2147483648, %v125_v23  ;;  %vm136_vm2 = vcmp.eq.f32.partialorder %v125_v23, 0.0 }
 0x10c   :  { %v124_v28 = vpop.xlane.xlu1 %123 }
 0x10d   :  { %v375_v29 = vpop.eup %374  ;;  %v126_v30 = vmul.f32 0.032258064, %v124_v28 }
 0x10e   :  { %v128_v31 = vmul.f32 %v375_v29, %v125_v23 }
 0x10f   :  { %376 = vrsqrt.f32 %v126_v30  ;;  %vm146_vm3 = vcmp.eq.f32.partialorder %v126_v30, inf  ;;  %v149_v48 = vand.u32 2147483648, %v126_v30  ;;  %vm148_vm4 = vcmp.eq.f32.partialorder %v126_v30, 0.0 }
 0x110   :  { %v129_v32 = vmul.f32 %v375_v29, %v128_v31 }
 0x112   :  { %v130_v33 = vmul.f32 0.5, %v129_v32 }
 0x114   :  { %v131_v34 = vsub.f32 1.5, %v130_v33 }
 0x115   :  { %v377_v35 = vpop.eup %376 }
 0x116   :  { %v132_v36 = vmul.f32 %v375_v29, %v131_v34  ;;  %v140_v37 = vmul.f32 %v377_v35, %v126_v30 }
 0x118   :  { %v133_v38 = vmul.f32 %v132_v36, %v125_v23  ;;  %v141_v39 = vmul.f32 %v377_v35, %v140_v37 }
 0x11a   :  { %v135_v41 = vsel %vm134_vm1, %v125_v23, %v133_v38  ;;  %v142_v42 = vmul.f32 0.5, %v141_v39 }
 0x11b   :  { %v138_v43 = vsel %vm136_vm2, %v137_v40, %v135_v41 }
 0x11c   :  { %v143_v44 = vsub.f32 1.5, %v142_v42  ;;  %v151_v45 = vadd.f32 1e-06, %v138_v43 }
 0x11e   :  { %v144_v46 = vmul.f32 %v377_v35, %v143_v44  ;;  %378 = vrcp.f32 %v151_v45  ;;  %v164_v55 = vand.u32 2147483648, %v151_v45  ;;  %v162_v57 = vand.u32 2147483647, %v151_v45 }
 0x11f   :  { %vm158_vm6 = vweird.f32 %v151_v45 }
 0x120   :  { %v145_v47 = vmul.f32 %v144_v46, %v126_v30  ;;  %v165_v60 = vor.u32 1.1754944e-38, %v164_v55  ;;  %vm163_vm8 = vcmp.eq.f32.partialorder %v162_v57, 8.507059e+37 }
 0x122   :  { %v147_v49 = vsel %vm146_vm3, %v126_v30, %v145_v47 }
 0x123   :  { %v150_v50 = vsel %vm148_vm4, %v149_v48, %v147_v49 }
 0x124   :  { %v379_v51 = vpop.eup %378  ;;  %v152_v52 = vadd.f32 1e-06, %v150_v50 }
 0x125   :  { %v154_v53 = vmul.f32 %v379_v51, %v151_v45  ;;  %vm159_vm5 = vweird.f32 %v379_v51 }
 0x126   :  { %380 = vrcp.f32 %v152_v52  ;;  %vm160_vm7 = vmor %vm158_vm6, %vm159_vm5  ;;  %v179_v4 = vand.u32 2147483648, %v152_v52  ;;  %v177_v8 = vand.u32 2147483647, %v152_v52  ;;  %vm173_vm10 = vweird.f32 %v152_v52 }
 0x127   :  { %v155_v54 = vsub.f32 1.0, %v154_v53 }
 0x128   :  { %v180_v12 = vor.u32 1.1754944e-38, %v179_v4  ;;  %vm178_vm12 = vcmp.eq.f32.partialorder %v177_v8, 8.507059e+37 }
 0x129   :  { %v156_v56 = vmul.f32 %v379_v51, %v155_v54 }
 0x12b   :  { %v157_v58 = vadd.f32 %v379_v51, %v156_v56 }
 0x12c   :  { %v381_v59 = vpop.eup %380 }
 0x12d   :  { %v161_v62 = vsel %vm160_vm7, %v379_v51, %v157_v58  ;;  %v169_v63 = vmul.f32 %v381_v59, %v152_v52  ;;  %vm174_vm9 = vweird.f32 %v381_v59 }
 0x12e   :  { %v166_v0 = vsel %vm163_vm8, %v165_v60, %v161_v62  ;;  %vm175_vm11 = vmor %vm173_vm10, %vm174_vm9 }
 0x12f   :  { %v184_v1 = vmul.f32 %v183_v61, %v166_v0  ;;  %v170_v2 = vsub.f32 1.0, %v169_v63 }
 0x131   :  { %v186_v5 = vmul.f32 %v184_v1, %v655_v6  ;;  %v171_v7 = vmul.f32 %v381_v59, %v170_v2 }
 0x133   :  { %v189_v9 = vadd.f32 %v188_v3, %v186_v5  ;;  %v172_v10 = vadd.f32 %v381_v59, %v171_v7 }
 0x135   :  { %352 = vmatmul.msk.f32.vlgmr.msra.gmra.mxu0 %vm106_vm0, %v189_v9  ;;  %354 = vmatmul.msk.f32.vlgmr.msra.gmra.mxu1 %vm106_vm0, %v189_v9  ;;  %v176_v13 = vsel %vm175_vm11, %v381_v59, %v172_v10 }
 0x136   :  { %356 = vmatmul.msk.f32.vlgmr.msra.gmra.mxu2 %vm106_vm0, %v189_v9  ;;  %v181_v14 = vsel %vm178_vm12, %v180_v12, %v176_v13 }
 0x137   :  { %v185_v15 = vmul.f32 %v183_v61, %v181_v14 }
 0x139   :  { %v187_v6 = vmul.f32 %v185_v15, %v660_v11  ;;  %v373_v11 = vld [vmem:[%s720_s8] ss:$0 sm:$0xff] }
 0x13b   :  { %v190_v16 = vadd.f32 %v188_v3, %v187_v6 }
 0x13d   :  { %353 = vmatmul.msk.f32.vlgmr.msra.gmra.mxu3 %vm106_vm0, %v190_v16  ;;  %355 = vmatmul.msk.f32.gmra.mxu1 %vm106_vm0, %v190_v16 }
 0x13e   :  { %357 = vmatmul.msk.f32.gmra.mxu2 %vm106_vm0, %v190_v16 }
 0x1b2   :  { %v222_v19 = vpop.f32.mrf.mxu0  ;;  %v255_v20 = vpop.f32.mrf.mxu1 }
 0x1b3   :  { %v223_v21 = vadd.f32 %v371_v17, %v222_v19  ;;  %v256_v22 = vadd.f32 %v372_v18, %v255_v20 }
 0x1b5   :  { %228 = vst.msk [vmem:[#allocation12] sm:$0xff] %vm106_vm0, %v223_v21 }
 0x1b6   :  { %261 = vst.msk [vmem:[#allocation13] sm:$0xff] %vm106_vm0, %v256_v22 }
 0x1b9   :  { %v288_v23 = vpop.f32.mrf.mxu2 }
 0x1ba   :  { %v289_v24 = vadd.f32 %v373_v11, %v288_v23  ;;  %v258_v25 = vpop.f32.mrf.mxu1 }
 0x1bb   :  { %v259_v26 = vadd.f32 %v372_v18, %v258_v25 }
 0x1bc   :  { %294 = vst.msk [vmem:[#allocation15] sm:$0xff] %vm106_vm0, %v289_v24 }
 0x1bd   :  { %262 = vst.msk [vmem:[#allocation13 + $0x8] sm:$0xff] %vm106_vm0, %v259_v26 }
 0x1be   :  { %321 = dma.vmem_to_hbm [thread:$0]  %s314_s27, 256, %s316_s29, [#allocation14], %s561_s25, %s561_s25, %s562_s26  }
 0x1c0   :  { %v225_v27 = vpop.f32.mrf.mxu3 }
 0x1c1   :  { %v226_v28 = vadd.f32 %v371_v17, %v225_v27  ;;  %v291_v29 = vpop.f32.mrf.mxu2 }
 0x1c2   :  { %v292_v30 = vadd.f32 %v373_v11, %v291_v29 }
 0x1c3   :  { %229 = vst.msk [vmem:[#allocation12 + $0x8] sm:$0xff] %vm106_vm0, %v226_v28 }
 0x1c4   :  { %295 = vst.msk [vmem:[#allocation15 + $0x8] sm:$0xff] %vm106_vm0, %v292_v30  ;;  %308 = dma.vmem_to_hbm [thread:$0]  %s301_s30, 256, %s303_s2, [#allocation6], %s561_s25, %s561_s25, %s562_s26  }
 0x1c5   :  { %334 = dma.vmem_to_hbm [thread:$0]  %s327_s12, 256, %s329_s15, [#allocation14], %s561_s25, %s561_s25, %s562_s26  }
 0x1c6   :  { %556 = dma.done.wait [#allocation6], 256  }
 0x1c7   :  { %557 = vsyncadd [#allocation6], 4294967040 }
 0x1c8   :  { %558 = dma.done.wait [#allocation14], 512  }
 0x1c9   :  { %559 = vsyncadd [#allocation14], 4294966784 }
 0x1ca   :  { %347 = vsyncpa [#allocation5], 1 }
 0x1cb   :  { %348 = vsyncpa [#allocation8], 1 }
 0x1cc   :  { %349 = vsyncpa [#allocation11], 1 }
 0x1cd   :  { %350 = vsyncpa [#allocation6], 1 }
 0x1ce   :  { %351 = vsyncpa [#allocation14], 1 }

</bundles_post_ra>
